<compile_context>
chip_gen: v5e
topology: v5e:2x2
jax: 0.10.0
libtpu: 0.0.40
codegen_flags: <defaults>
</compile_context>

<pallas_src>
import functools

import numpy as np
import jax
import jax.numpy as jnp
from jax.experimental import pallas as pl
from jax.experimental.pallas import tpu as pltpu


_FILTERS = {
    1: [1.0],
    2: [1.0, 1.0],
    3: [1.0, 2.0, 1.0],
    4: [1.0, 3.0, 3.0, 1.0],
    5: [1.0, 4.0, 6.0, 4.0, 1.0],
    6: [1.0, 5.0, 10.0, 10.0, 5.0, 1.0],
    7: [1.0, 6.0, 15.0, 20.0, 15.0, 6.0, 1.0],
}


def _pad_sizes(filt_size, pad_off):
    pad_l = int(1.0 * (filt_size - 1) / 2) + pad_off
    pad_r = int(np.ceil(1.0 * (filt_size - 1) / 2)) + pad_off
    return pad_l, pad_r


def _downsample_matrix(size, filt_size, stride, pad_off, pad_type):
    """Build A (out, size) so that A @ v == pad + 1-D blur + stride of v."""
    a = np.asarray(_FILTERS[filt_size], dtype=np.float64)
    a = a / a.sum()   # separable 1-D factor of the normalized 2-D filter
    pad_l, pad_r = _pad_sizes(filt_size, pad_off)

    pos = np.arange(-pad_l, size + pad_r)
    if pad_type in ("refl", "reflect"):
        idx = np.pad(np.arange(size), (pad_l, pad_r), mode="reflect")
    elif pad_type in ("repl", "replicate"):
        idx = np.pad(np.arange(size), (pad_l, pad_r), mode="edge")
    elif pad_type == "zero":
        idx = np.where((pos >= 0) & (pos < size), pos, -1)
    else:
        raise ValueError("pad type [%s] not recognized" % pad_type)

    padded = size + pad_l + pad_r
    out = (padded - filt_size) // stride + 1
    A = np.zeros((out, size), dtype=np.float32)
    for i in range(out):
        for t in range(filt_size):
            src = idx[i * stride + t]
            if src >= 0:                      # zero-pad taps contribute nothing
                A[i, src] += a[t]
    return jnp.asarray(A, dtype=jnp.float32)


def downsample_kernel(x_ref, aht_ref, awt_ref, o_ref, *, mxu_dtype):
    """One grid step: (tb, H, W) stack of planes -> (tb, Ho, Wo).

    Two single 2-D matmuls with large M; each A matrix used exactly once per
    step (no broadcast_to, no batched per-plane matmuls).  Shape ops happen in
    the f32 accumulator domain; operands are cast to `mxu_dtype` just before
    each dot (f32 accumulation kept via preferred_element_type).
    """
    tb, H, W = x_ref.shape
    Ho = aht_ref.shape[1]
    Wo = awt_ref.shape[1]

    awt = awt_ref[...].astype(mxu_dtype)                  # (W, Wo)  resident
    aht = aht_ref[...].astype(mxu_dtype)                  # (H, Ho)  resident

    # --- W direction: pad + blur + stride folded into A_w^T.
    #     Single matmul, M = tb*H, K = W, N = Wo.
    x2 = x_ref[...].reshape(tb * H, W).astype(mxu_dtype)
    y = jnp.dot(x2, awt, preferred_element_type=jnp.float32)   # (tb*H, Wo) f32
    y = y.reshape(tb, H, Wo)

    # --- per-plane minor-dim transpose (XLU slot, overlaps MXU) so the H
    #     contraction is also one big 2-D matmul: M = tb*Wo, K = H, N = Ho.
    yt = jnp.swapaxes(y, 1, 2)                                  # (tb, Wo, H)
    y2 = yt.reshape(tb * Wo, H).astype(mxu_dtype)
    z = jnp.dot(y2, aht, preferred_element_type=jnp.float32)    # (tb*Wo, Ho)
    z = z.reshape(tb, Wo, Ho)

    # --- transpose back to (tb, Ho, Wo) and store.
    o_ref[...] = jnp.swapaxes(z, 1, 2).astype(o_ref.dtype)


def downsample(x_nchw, *, filt_size=3, stride=2, pad_off=0, pad_type="reflect",
               tile_bytes=4 << 20, mxu_dtype=jnp.bfloat16, input_buffers=2):
    """Downsample.forward for an NCHW tensor.  Returns (N, C, Ho, Wo).

    `tile_bytes` targets the per-step x tile size (~4-8 MiB recommended).
    `input_buffers=3` adds a third input buffer (v5e, if DMA is exposed).
    Pass a bf16 `x_nchw` to additionally halve HBM traffic (output stays bf16).
    """
    N, C, H, W = x_nchw.shape
    B = N * C

    ah = _downsample_matrix(H, filt_size, stride, pad_off, pad_type)   # (Ho, H)
    aw = _downsample_matrix(W, filt_size, stride, pad_off, pad_type)   # (Wo, W)
    Ho, Wo = ah.shape[0], aw.shape[0]
    aht, awt = ah.T, aw.T                                              # (H,Ho), (W,Wo)

    # Depthwise filter identical across channels -> (N, C) is a pure batch
    # axis.  Free reshape, no NHWC transpose, no extra HBM round trip.
    x = x_nchw.reshape(B, H, W)
    itemsize = x.dtype.itemsize

    # ---- tile sizing: ~tile_bytes of x per step, >=2 grid steps, fits VMEM.
    plane_in = H * W * itemsize
    plane_out = Ho * Wo * itemsize
    # f32 intermediates y/yt/z + bf16 operand copies (generous upper bound).
    plane_tmp = (H * Wo + Wo * H + Wo * Ho) * 4 + (H * W + Wo * H) * 2

    tb = max(1, min(B, tile_bytes // max(plane_in, 1)))
    if B >= 2:                       # >=2 steps: v7x shards "parallel" axis
        tb = min(tb, (B + 1) // 2)   # across both TensorCores + pipelining

    n_in_bufs = max(2, int(input_buffers))
    a_bytes = 2 * (H * Ho + W * Wo) * 4
    vmem_cap = 48 << 20              # v7x-safe (64 MiB physical VMEM)

    def footprint(t):
        return (n_in_bufs * t * plane_in + 2 * t * plane_out
                + t * plane_tmp + a_bytes + (2 << 20))

    while tb > 1 and footprint(tb) > vmem_cap:
        tb = max(1, tb // 2)

    num_steps = (B + tb - 1) // tb   # ragged last tile: OOB writes are masked
    vmem_limit = int(min(vmem_cap, max(16 << 20, footprint(tb))))

    x_spec_kwargs = {}
    if n_in_bufs != 2:
        x_spec_kwargs["pipeline_mode"] = pl.Buffered(n_in_bufs)
    x_spec = pl.BlockSpec((tb, H, W), lambda i: (i, 0, 0), **x_spec_kwargs)

    flops = 2 * B * H * Wo * (W + Ho)
    bytes_accessed = itemsize * (B * H * W + B * Ho * Wo) + 4 * (H * Ho + W * Wo)

    kernel = functools.partial(downsample_kernel, mxu_dtype=mxu_dtype)

    out = pl.pallas_call(
        kernel,
        out_shape=jax.ShapeDtypeStruct((B, Ho, Wo), x.dtype),
        grid=(num_steps,),
        in_specs=[
            x_spec,                                       # pipelined x tile
            pl.BlockSpec((H, Ho), lambda i: (0, 0)),      # resident A_h^T
            pl.BlockSpec((W, Wo), lambda i: (0, 0)),      # resident A_w^T
        ],
        out_specs=pl.BlockSpec((tb, Ho, Wo), lambda i: (i, 0, 0)),
        compiler_params=pltpu.CompilerParams(
            dimension_semantics=("parallel",),
            vmem_limit_bytes=vmem_limit),
        cost_estimate=pl.CostEstimate(
            flops=flops, transcendentals=0, bytes_accessed=bytes_accessed),
    )(x, aht, awt)

    return out.reshape(N, C, Ho, Wo)


def _reference(x_nchw, *, filt_size=3, stride=2, pad_off=0, pad_type="reflect"):
    """Plain-JAX reference (reflect pad + depthwise conv) for validation."""
    N, C, H, W = x_nchw.shape
    a = jnp.asarray(_FILTERS[filt_size], dtype=jnp.float32)
    filt = a[:, None] * a[None, :]
    filt = filt / jnp.sum(filt)
    pad_l, pad_r = _pad_sizes(filt_size, pad_off)
    mode = {"refl": "reflect", "reflect": "reflect",
            "repl": "edge", "replicate": "edge", "zero": "constant"}[pad_type]
    xp = jnp.pad(x_nchw, ((0, 0), (0, 0), (pad_l, pad_r), (pad_l, pad_r)), mode=mode)
    w = jnp.broadcast_to(filt, (C, 1, filt_size, filt_size))
    return jax.lax.conv_general_dilated(
        xp, w, window_strides=(stride, stride), padding="VALID",
        dimension_numbers=("NCHW", "OIHW", "NCHW"),
        feature_group_count=C,
        precision=jax.lax.Precision.HIGHEST)


if __name__ == "__main__":
    # Downsample(channels=4) at small shapes: batch=2, channels=4, 16x16 spatial.
    N, C, H, W = 2, 4, 16, 16
    key = jax.random.PRNGKey(0)
    # Half-integer inputs in [-4, 3.5]: exactly representable in bf16, so the
    # bf16-MXU / f32-accumulation path stays very close to the f32 reference.
    x = jax.random.randint(key, (N, C, H, W), -8, 8).astype(jnp.float32) * 0.5

    ref = _reference(x)

    # Default path: tb = 4 -> grid = (2,): evenly divided, pipelined tiles.
    out = downsample(x)
    out = jax.block_until_ready(out)
    assert out.shape == (N, C, H // 2, W // 2), out.shape
    assert ref.shape == out.shape, (ref.shape, out.shape)
    max_err = float(jnp.max(jnp.abs(out - ref)))
    assert max_err <= 1e-2, max_err   # bf16 MXU operands, f32 accumulation

    # Ragged-grid path: tb = 3 -> grid = (3,), masked partial last tile.
    out2 = downsample(x, tile_bytes=3 * H * W * 4)
    out2 = jax.block_until_ready(out2)
    max_err2 = float(jnp.max(jnp.abs(out2 - ref)))
    assert max_err2 <= 1e-2, max_err2

    print("KERNEL_OK")
</pallas_src>

<mosaic_0001>
module attributes {stable_mosaic.version = 11 : i64} {
  func.func @downsample_kernel(%arg0: i32, %arg1: memref<4x16x16xf32, #tpu.memory_space<vmem>>, %arg2: memref<16x8xf32, #tpu.memory_space<vmem>>, %arg3: memref<16x8xf32, #tpu.memory_space<vmem>>, %arg4: memref<4x8x8xf32, #tpu.memory_space<vmem>>) attributes {dimension_semantics = [#tpu.dimension_semantics<parallel>], iteration_bounds = array<i64: 2>, scalar_prefetch = 0 : i64, scratch_operands = 0 : i64, tpu.core_type = #tpu.core_type<tc>, window_params = [{transform_indices = @transform_0, window_bounds = array<i64: 4, 16, 16>}, {pipeline_mode = #tpu.pipeline_mode<synchronous>, transform_indices = @transform_1, window_bounds = array<i64: 16, 8>}, {pipeline_mode = #tpu.pipeline_mode<synchronous>, transform_indices = @transform_2, window_bounds = array<i64: 16, 8>}, {transform_indices = @transform_3, window_bounds = array<i64: 4, 8, 8>}]} {
    %c0 = arith.constant 0 : index
    %c0_0 = arith.constant 0 : index
    %0 = vector.load %arg3[%c0, %c0_0] : memref<16x8xf32, #tpu.memory_space<vmem>>, vector<16x8xf32>
    %1 = arith.truncf %0 : vector<16x8xf32> to vector<16x8xbf16>
    %c0_1 = arith.constant 0 : index
    %c0_2 = arith.constant 0 : index
    %2 = vector.load %arg2[%c0_1, %c0_2] : memref<16x8xf32, #tpu.memory_space<vmem>>, vector<16x8xf32>
    %3 = arith.truncf %2 : vector<16x8xf32> to vector<16x8xbf16>
    %c0_3 = arith.constant 0 : index
    %c0_4 = arith.constant 0 : index
    %c0_5 = arith.constant 0 : index
    %4 = vector.load %arg1[%c0_3, %c0_4, %c0_5] : memref<4x16x16xf32, #tpu.memory_space<vmem>>, vector<4x16x16xf32>
    %5 = vector.shape_cast %4 : vector<4x16x16xf32> to vector<64x16xf32>
    %6 = arith.truncf %5 : vector<64x16xf32> to vector<64x16xbf16>
    %cst = arith.constant dense<0.000000e+00> : vector<64x8xf32>
    %7 = tpu.matmul %6, %1, %cst {dimension_numbers = #tpu.dot_dimension_numbers<[1], [0], [0], [1], [0, 0, 1, 1], [], []>} : vector<64x16xbf16>, vector<16x8xbf16>, vector<64x8xf32> -> vector<64x8xf32>
    %8 = vector.shape_cast %7 : vector<64x8xf32> to vector<4x16x8xf32>
    %9 = tpu.transpose %8, [0, 2, 1] : vector<4x16x8xf32> -> vector<4x8x16xf32>
    %10 = vector.shape_cast %9 : vector<4x8x16xf32> to vector<32x16xf32>
    %11 = arith.truncf %10 : vector<32x16xf32> to vector<32x16xbf16>
    %cst_6 = arith.constant dense<0.000000e+00> : vector<32x8xf32>
    %12 = tpu.matmul %11, %3, %cst_6 {dimension_numbers = #tpu.dot_dimension_numbers<[1], [0], [0], [1], [0, 0, 1, 1], [], []>} : vector<32x16xbf16>, vector<16x8xbf16>, vector<32x8xf32> -> vector<32x8xf32>
    %13 = vector.shape_cast %12 : vector<32x8xf32> to vector<4x8x8xf32>
    %14 = tpu.transpose %13, [0, 2, 1] : vector<4x8x8xf32> -> vector<4x8x8xf32>
    %c0_7 = arith.constant 0 : index
    %c0_8 = arith.constant 0 : index
    %c0_9 = arith.constant 0 : index
    %15 = vector.load %arg4[%c0_7, %c0_8, %c0_9] : memref<4x8x8xf32, #tpu.memory_space<vmem>>, vector<4x8x8xf32>
    tpu.vector_store %arg4[%c0_7, %c0_8, %c0_9], %14 {strides = array<i32>} : memref<4x8x8xf32, #tpu.memory_space<vmem>>, vector<4x8x8xf32>,
    return
  }
  func.func @transform_0(%arg0: i32) -> (i32, i32, i32) {
    %c0_i32 = arith.constant 0 : i32
    %c0_i32_0 = arith.constant 0 : i32
    %c0_i32_1 = arith.constant 0 : i32
    return %arg0, %c0_i32, %c0_i32_0 : i32, i32, i32
  }
  func.func @transform_1(%arg0: i32) -> (i32, i32) {
    %c0_i32 = arith.constant 0 : i32
    %c0_i32_0 = arith.constant 0 : i32
    %c0_i32_1 = arith.constant 0 : i32
    return %c0_i32, %c0_i32_0 : i32, i32
  }
  func.func @transform_2(%arg0: i32) -> (i32, i32) {
    %c0_i32 = arith.constant 0 : i32
    %c0_i32_0 = arith.constant 0 : i32
    %c0_i32_1 = arith.constant 0 : i32
    return %c0_i32, %c0_i32_0 : i32, i32
  }
  func.func @transform_3(%arg0: i32) -> (i32, i32, i32) {
    %c0_i32 = arith.constant 0 : i32
    %c0_i32_0 = arith.constant 0 : i32
    %c0_i32_1 = arith.constant 0 : i32
    return %arg0, %c0_i32, %c0_i32_0 : i32, i32, i32
  }
}

</mosaic_0001>

<bundles_post_ra>
// kernel: tpu_custom_call.1
= control target key start
LH: loop header
LB: loop body
LE: loop exit
PB: predicated region body
PF: predicated region fallthrough
CT: control target
= control target key end

     0   :  { %8 = vsyncpa [#allocation3], 0  ;;  %s995_s0 = inlined_call_operand.hbm [shape: f32[8,16,16], index: 0, kind: input, shape index: {}]   ;;  %s996_s1 = inlined_call_operand.vmem [shape: f32[16,8], index: 1, kind: input, shape index: {}]   ;;  %s997_s2 = inlined_call_operand.vmem [shape: f32[16,8], index: 2, kind: input, shape index: {}]   ;;  %s998_s3 = inlined_call_operand.hbm [shape: f32[8,8,8], index: 3, kind: output, shape index: {}]  }
   0x1   :  { %10 = vsyncpa [#allocation3 + $0x1], 0 }
   0x2   :  { %11 = vsyncpa [#allocation4], 0 }
   0x3   :  { %13 = vsyncpa [#allocation4 + $0x1], 0  ;;  %s849_s12 = smov 0   ;;  %s851_s13 = smov 0  }
   0x4   :  { %s853_s14 = smov 0   ;;  %s855_s15 = smov 0  }
   0x5 LB: > { %s870_s16 = sadd.s32 4294967295, %s823_s15   ;;  %s632_s17 = sadd.s32 4294967294, %s823_s15   ;;  %s823_s15 = sphi %s855_s15, %s1008_s15   ;;  %s819_s14 = sphi %s853_s14, %s1007_s14   ;;  %s815_s13 = sphi %s851_s13, %s1006_s13   ;;  %s811_s12 = sphi %s849_s12, %s1005_s12  }
   0x6   : > { %s874_s18 = sadd.s32 1, %s823_s15   ;;  %s26_s19 = sadd.s32 1, %s819_s14 }
   0x7   : > { %s23_s20 = ssub.s32 %s823_s15, %s874_s18  ;;  %p33_p0 = scmp.ne.s32.totalorder %s819_s14, %s815_s13 }
   0x8   : > { %p24_p1 = scmp.eq.s32.totalorder %s23_s20, 0  ;;  %p34_p2 = scmp.eq.s32.totalorder %s823_s15, 0 }
   0x9   : > { %p39_p3 = scmp.ne.s32.totalorder %s815_s13, %s811_s12  ;;  %p40_p4 = scmp.eq.s32.totalorder %s870_s16, 0 }
   0xa   : > { %s886_s21 = scalar_select %p24_p1, %s819_s14, %s26_s19  }
   0xb   : > { %p888_p5 = por %p34_p2, %p33_p0  ;;  %p892_p6 = por %p40_p4, %p39_p3 }
   0xc   : > { %p105_p7 = scmp.eq.s32.totalorder %s870_s16, 1  ;;  %p111_p8 = scmp.eq.s32.totalorder %s632_s17, 1 }
   0xd   : > { %p670_p10 = scmp.lt.s32.totalorder %s823_s15, 2  ;;  %s137_s26 = sand.u32 1, %s819_s14  }
   0xe   : > { %p899_p11 = por %p105_p7, %p33_p0  ;;  %p903_p12 = por %p111_p8, %p39_p3 }
   0xf   : > { %s654_s27 = sshll.u32 %s823_s15, 6  ;;  %s635_s28 = sshll.u32 %s137_s26, 6 }
  0x10   : > { %s147_s4 = scalar_lea.hbm %s995_s0, %s654_s27  ;;  %s141_s6 = scalar_lea.vmem [#allocation2], %s635_s28 }
  0x11   : > { %s148_s5 = sshll.u32 %s147_s4, 4  ;;  %s150_s7 = sshll.u32 %s141_s6, 4  ;;  %s149_s5 = int_to_ptr.hbm [resolvable:$true] %s148_s5  ;;  %s151_s7 = int_to_ptr.vmem [resolvable:$true] %s150_s7 }
  0x12   : > { %p914_p13 = pnand %p670_p10, %p888_p5  ;;  %p639_p0 = scmp.ge.s32.totalorder %s823_s15, 1 }
  0x13   : > { %p158_p1 = scmp.lt.s32.totalorder %s823_s15, 3  ;;  %s138_s9 = scalar_lea.sflag [#allocation3], %s137_s26 }
  0x14   : > { %s727_s10 = sshra.s32 %s149_s5, 4  ;;  %p731_p3 = pneg %p914_p13  ;;  %s728_s10 = int_to_ptr.hbm [resolvable:$true] %s727_s10 }
  0x15   : > { %s729_s11 = scalar_lea.hbm %s728_s10, 64  ;;  %s734_s20 = scalar_lea.hbm %s995_s0, 128 }
  0x16   : > { %p730_p2 = scmp.ne.s32.totalorder %s728_s10, %s729_s11  ;;  %p735_p5 = scmp.lt.s32.totalorder %s728_s10, %s995_s0 }
  0x17   : > { %p736_p8 = scmp.lt.s32.totalorder %s734_s20, %s729_s11 }
  0x18   : > { %p732_p4 = pnand %p731_p3, %p730_p2 }
  0x19   : > { %p737_p10 = por %p736_p8, %p735_p5 }
  0x1a   : > { %p733_p7 = pneg %p732_p4 }
  0x1c   : > { %p738_p9 = pnand %p737_p10, %p733_p7 }
  0x1e   : > { %741 = shalt.err (!%p738_p9)
}
  0x1f   : > { %s825_s26 = smov 128   ;;  %s826_s28 = smov 8  }
  0x20   : > { %665 = dma.hbm_to_vmem [thread:$0]  (!%p914_p13), %s149_s5, 1024, %s151_s7, %s138_s9, %s825_s26, %s825_s26, %s826_s28  }
  0x21   : > { %p159_p2 = pnand %p639_p0, %p158_p1 }
  0x22   : > { %s935_s29 = sand.u32 (!%p159_p2), 1, %s815_s13  }
  0x23   : > { %162 = sbr.rel (%p159_p2) target bundleno = 669 (0x29d), region = 32  ;;  %s640_s30 = sshll.u32 (!%p159_p2), %s935_s29, 6 }
  0x24   : > { %s165_s4 = scalar_lea.sflag (!%p159_p2), [#allocation3], %s935_s29  ;;  %s168_s6 = scalar_lea.vmem (!%p159_p2), [#allocation2], %s640_s30 }
  0x28   : > { %802 = dma.done.wait (%p892_p6), %s165_s4, 1024  }
  0x29   : > { %804 = vsyncadd (%p892_p6), %s165_s4, 4294966272  ;;  %v195_v0 = vld [vmem:[%s997_s2] sm:$0xff]  ;;  %v196_v1 = vld [vmem:[%s997_s2 + $0x8] sm:$0xff]  ;;  %vm213_vm0 = vcmask 130048   ;;  %s641_s19 = sshll.u32 %s935_s29, 5  ;;  %vm538_vm1 = vcmask 64512  }
  0x2a   : > { %v201_v2 = vld [vmem:[%s168_s6] sm:$0xff]  ;;  %v197_v3 = vpack.c.bf16 %v196_v1, %v195_v0  ;;  %v202_v4 = vld [vmem:[%s168_s6 + $0x8] sm:$0xff]  ;;  %v203_v5 = vld [vmem:[%s168_s6 + $0x10] sm:$0xff]  ;;  %s191_s20 = scalar_lea.vmem [#allocation5], %s641_s19  ;;  %s655_s22 = sshll.u32 %s870_s16, 5 }
  0x2b   : > { %v204_v6 = vld [vmem:[%s168_s6 + $0x18] sm:$0xff]  ;;  %v209_v7 = vpack.c.bf16 %v202_v4, %v201_v2  ;;  %v207_v9 = vld [vmem:[%s168_s6 + $0x30] sm:$0xff]  ;;  %v205_v12 = vld [vmem:[%s168_s6 + $0x20] sm:$0xff]  ;;  %s555_s28 = scalar_lea.hbm %s998_s3, %s655_s22  ;;  %s556_s30 = sshll.u32 %s191_s20, 4  ;;  %s557_s30 = int_to_ptr.vmem [resolvable:$true] %s556_s30 }
  0x2c   : > { %v210_v8 = vpack.c.bf16 %v204_v6, %v203_v5  ;;  %v208_v10 = vld [vmem:[%s168_s6 + $0x38] sm:$0xff]  ;;  %233 = vmatpush.bf16.msra.mxu0 %v197_v3  ;;  %656 = vmatpush.bf16.msra.mxu2 %v197_v3  ;;  %v206_v13 = vld [vmem:[%s168_s6 + $0x28] sm:$0xff]  ;;  %v198_v27 = vld [vmem:[%s996_s1] sm:$0xff]  ;;  %s558_s4 = sshll.u32 %s555_s28, 4  ;;  %s544_s6 = scalar_lea.sflag [#allocation4], %s935_s29  ;;  %s559_s4 = int_to_ptr.hbm [resolvable:$true] %s558_s4 }
  0x2d   : > { %v212_v11 = vpack.c.bf16 %v208_v10, %v207_v9  ;;  %657 = vmatpush.bf16.msra.mxu3 %v197_v3  ;;  %v211_v14 = vpack.c.bf16 %v206_v13, %v205_v12  ;;  %v199_v28 = vld [vmem:[%s996_s1 + $0x8] sm:$0xff]  ;;  %s771_s8 = sshra.s32 %s559_s4, 4  ;;  %s777_s9 = scalar_lea.hbm %s998_s3, 64  ;;  %s772_s8 = int_to_ptr.hbm [resolvable:$true] %s771_s8 }
  0x2e   : > { %v200_v29 = vpack.c.bf16 %v199_v28, %v198_v27  ;;  %s773_s5 = scalar_lea.hbm %s772_s8, 32  ;;  %p778_p0 = scmp.lt.s32.totalorder %s772_s8, %s998_s3 }
  0x2f   : > { %642 = vmatmul.msk.bf16.vlgmr.msra.gmra.mxu0 %vm213_vm0, %v209_v7  ;;  %643 = vmatmul.msk.bf16.vlgmr.msra.gmra.mxu2 %vm213_vm0, %v210_v8  ;;  %p774_p6 = scmp.ne.s32.totalorder %s772_s8, %s773_s5  ;;  %p779_p1 = scmp.lt.s32.totalorder %s777_s9, %s773_s5 }
  0x30   : > { %645 = vmatmul.msk.bf16.vlgmr.msra.gmra.mxu3 %vm213_vm0, %v212_v11  ;;  %398 = vmatpush.bf16.msra.mxu1 %v200_v29 }
  0x31   : > { %p775_p9 = pnand %p774_p6, %p899_p11  ;;  %p780_p3 = por %p779_p1, %p778_p0 }
  0x33   : > { %p776_p13 = pneg %p775_p9 }
  0x35   : > { %p781_p4 = pnand %p780_p3, %p776_p13 }
  0x3f   : > { %644 = vmatmul.msk.bf16.gmra.mxu2 %vm213_vm0, %v211_v14 }
  0xac   : > { %v235_v15 = vpop.f32.mrf.mxu0 }
  0xb2   : > { %v240_v16 = vpop.f32.mrf.mxu2 }
  0xb3   : > { %v709_v17 = vpack.i.bf16 %v240_v16, %v235_v15  ;;  %v250_v21 = vpop.f32.mrf.mxu3 }
  0xb4   : > { %v237_v18 = vpop.f32.mrf.mxu0 }
  0xb5   : > { %710 = vxpose.xlu0.b32.start [1/2] (short) (narrow) %v709_v17, 8 }
  0xba   : > { %v242_v19 = vpop.f32.mrf.mxu2 }
  0xbb   : > { %v711_v20 = vpack.i.bf16 %v242_v19, %v237_v18  ;;  %v252_v24 = vpop.f32.mrf.mxu3 }
  0xbd   : > { %712 = vxpose.xlu0.b32.end [2/2] (short) (narrow) %v711_v20, 8 }
  0xc2   : > { %v245_v22 = vpop.f32.mrf.mxu2 }
  0xc3   : > { %v718_v23 = vpack.i.bf16 %v250_v21, %v245_v22 }
  0xc5   : > { %719 = vxpose.xlu1.b32.start [1/2] (short) (narrow) %v718_v23, 8 }
  0xca   : > { %v247_v25 = vpop.f32.mrf.mxu2 }
  0xcb   : > { %v720_v26 = vpack.i.bf16 %v252_v24, %v247_v25 }
  0xcd   : > { %721 = vxpose.xlu1.b32.end [2/2] (short) (narrow) %v720_v26, 8 }
 0x159   : > { %v713_v30 = vpop.trf.xlu0 }
 0x15a   : > { %v717_v31 = vunpack.i.h.bf16 %v713_v30  ;;  %v714_v32 = vunpack.i.l.bf16 %v713_v30 }
 0x15c   : > { %v383_v33 = vpack.c.bf16 %v717_v31, %v714_v32 }
 0x15e   : > { %646 = vmatmul.msk.bf16.vlgmr.msra.gmra.mxu1 %vm213_vm0, %v383_v33 }
 0x169   : > { %v722_v34 = vpop.trf.xlu1 }
 0x16a   : > { %v726_v35 = vunpack.i.h.bf16 %v722_v34  ;;  %v723_v36 = vunpack.i.l.bf16 %v722_v34 }
 0x16c   : > { %v384_v37 = vpack.c.bf16 %v726_v35, %v723_v36 }
 0x16e   : > { %647 = vmatmul.msk.bf16.gmra.mxu1 %vm213_vm0, %v384_v37 }
 0x1db   : > { %v400_v38 = vpop.f32.mrf.mxu1 }
 0x1dc   : > { %410 = vxpose.xlu2.b32.start.end [1/1] (short) (narrow) %v400_v38, 8 }
 0x1e3   : > { %v402_v39 = vpop.f32.mrf.mxu1 }
 0x1e4   : > { %442 = vxpose.xlu2.b32.start.end [1/1] (short) (narrow) %v402_v39, 8 }
 0x1eb   : > { %v405_v40 = vpop.f32.mrf.mxu1 }
 0x1ec   : > { %474 = vxpose.xlu0.b32.start.end [1/1] (short) (narrow) %v405_v40, 8 }
 0x1f3   : > { %v407_v41 = vpop.f32.mrf.mxu1 }
 0x1f4   : > { %506 = vxpose.xlu1.b32.start.end [1/1] (short) (narrow) %v407_v41, 8 }
 0x275   : > { %v426_v42 = vpop.trf.xlu2 }
 0x276   : > { %539 = vst.msk [vmem:[%s191_s20] sm:$0xff] %vm538_vm1, %v426_v42 }
 0x27d   : > { %v458_v43 = vpop.trf.xlu2 }
 0x27e   : > { %540 = vst.msk [vmem:[%s191_s20 + $0x8] sm:$0xff] %vm538_vm1, %v458_v43 }
 0x290   : > { %v490_v44 = vpop.trf.xlu0 }
 0x291   : > { %541 = vst.msk [vmem:[%s191_s20 + $0x10] sm:$0xff] %vm538_vm1, %v490_v44 }
 0x298   : > { %v522_v45 = vpop.trf.xlu1 }
 0x299   : > { %542 = vst.msk [vmem:[%s191_s20 + $0x18] sm:$0xff] %vm538_vm1, %v522_v45 }
 0x29a   : > { %784 = shalt.err (!%p781_p4)
}
 0x29b   : > { %s827_s29 = smov 128   ;;  %s828_s11 = smov 8  }
 0x29c   : > { %660 = dma.vmem_to_hbm [thread:$0]  (%p899_p11), %s557_s30, 512, %s559_s4, %s544_s6, %s827_s29, %s827_s29, %s828_s11  }
 0x29d PF: > { %s573_s17 = sand.u32 1, %s811_s12   ;;  %p1004_p7 = scmp.ge.s32.totalorder %s823_s15, 2 }
 0x29e   : > { %s574_s19 = scalar_lea.sflag [#allocation4], %s573_s17 }
 0x29f   : > { %p667_p5 = pnand %p1004_p7, %p903_p12 }
 0x2a1   : > { %p668_p8 = pneg %p667_p5 }
 0x2a3   : > { %806 = dma.done.wait (%p668_p8), %s574_s19, 512  }
 0x2a4   : > { %808 = vsyncadd (%p668_p8), %s574_s19, 4294966784  ;;  %p16_p10 = scmp.ge.s32.totalorder %s874_s18, 4   ;;  %s1005_s12 = smov %s815_s13 }
 0x2a5   : > { %s1006_s13 = smov %s819_s14  ;;  %s1007_s14 = smov %s886_s21 }
 0x2a6   : > { %s1008_s15 = smov %s874_s18  ;;  %18 = sbr.rel (!%p16_p10) target bundleno = 5 (0x5), region = 77 }
 0x2ab   :  { %580 = vsyncpa [#allocation3], 1 }
 0x2ac   :  { %582 = vsyncpa [#allocation3 + $0x1], 1 }
 0x2ad   :  { %583 = vsyncpa [#allocation4], 1 }
 0x2ae   :  { %585 = vsyncpa [#allocation4 + $0x1], 1 }

</bundles_post_ra>
